<compile_context>
chip_gen: v7x
topology: tpu7x:2x2x1
jax: 0.10.0
libtpu: 0.0.40
codegen_flags: <defaults>
</compile_context>

<pallas_src>
import math

import jax
import jax.numpy as jnp
from jax.experimental import pallas as pl
from jax.experimental.pallas import tpu as pltpu


def _round_up(x, m):
    return ((x + m - 1) // m) * m


def _pick_tile(n, options):
    for t in options:
        if n % t == 0:
            return t
    return options[-1]  # unreachable when n is a multiple of 128


# ----------------------------------------------------------------------------
# Stage A: support = x @ w  (only used when Fin is wider than padded Fout).
# ----------------------------------------------------------------------------
def _support_kernel(x_ref, w_ref, o_ref):
    o_ref[...] = jnp.dot(
        x_ref[...], w_ref[...],
        preferred_element_type=jnp.float32).astype(o_ref.dtype)


def _compute_support(xb, wb, Np, Fp):
    """xb: [B, Np, Fin] bf16, wb: [Fin, Fp] bf16 -> support [B, Np, Fp] bf16."""
    B, _, Fin = xb.shape
    TS = _pick_tile(Np, (256, 128))
    return pl.pallas_call(
        _support_kernel,
        out_shape=jax.ShapeDtypeStruct((B, Np, Fp), jnp.bfloat16),
        grid_spec=pltpu.PrefetchScalarGridSpec(
            num_scalar_prefetch=0,
            grid=(B, Np // TS),
            in_specs=[
                pl.BlockSpec((None, TS, Fin), lambda b, i: (b, i, 0)),
                pl.BlockSpec((Fin, Fp), lambda b, i: (0, 0)),
            ],
            out_specs=pl.BlockSpec((None, TS, Fp), lambda b, i: (b, i, 0)),
        ),
        compiler_params=pltpu.CompilerParams(
            dimension_semantics=("parallel", "parallel")),
    )(xb, wb)


# ----------------------------------------------------------------------------
# Stage B: out = adj @ feat  [@ w]  (+ bias), tiled reduction over nodes.
# ----------------------------------------------------------------------------
def _make_agg_kernel(fin_first, has_bias):
    """Refs (in order): feat (TK, W), adj (TM, TK), [w (Finp, Fp)],
    [bias (1, Fp)], out (TM, Fp), acc scratch (TM, W) f32."""

    def kernel(*refs):
        idx = 0
        feat_ref = refs[idx]; idx += 1
        adj_ref = refs[idx]; idx += 1
        w_ref = None
        if fin_first:
            w_ref = refs[idx]; idx += 1
        b_ref = None
        if has_bias:
            b_ref = refs[idx]; idx += 1
        o_ref = refs[idx]; idx += 1
        acc_ref = refs[idx]

        k = pl.program_id(2)

        @pl.when(k == 0)
        def _init():
            acc_ref[...] = jnp.zeros_like(acc_ref)

        # bf16 x bf16 -> f32 accumulate on the MXU.
        acc_ref[...] += jnp.dot(adj_ref[...], feat_ref[...],
                                preferred_element_type=jnp.float32)

        @pl.when(k == pl.num_programs(2) - 1)
        def _finalize():
            if fin_first:
                # Weight applied exactly once per output tile.
                out = jnp.dot(acc_ref[...].astype(jnp.bfloat16), w_ref[...],
                              preferred_element_type=jnp.float32)
            else:
                out = acc_ref[...]
            if has_bias:
                out = out + b_ref[...]          # (1, Fp) broadcast, f32
            o_ref[...] = out.astype(o_ref.dtype)

    return kernel


def graph_convolution(x, adj, weight, bias=None):
    """Pallas GCN layer.

    x: [B, N, Fin], adj: [B, N, N], weight: [Fin, Fout],
    bias: [1, 1, Fout] (or [Fout]) or None.  Returns [B, N, Fout] in x.dtype.
    """
    B, N, Fin = x.shape
    assert weight.shape[0] == Fin
    Fout = weight.shape[1]
    assert adj.shape == (B, N, N)
    out_dtype = x.dtype

    Np = _round_up(N, 128)
    Fp = _round_up(Fout, 128)
    Finp = _round_up(Fin, 128)

    # Association: stream the narrower feature width through the k loop.
    fin_first = Finp <= Fp

    # bf16 MXU inputs; zero-pad nodes / features for lane-dense full tiles.
    adj_b = jnp.pad(adj, ((0, 0), (0, Np - N), (0, Np - N))).astype(jnp.bfloat16)

    if fin_first:
        feat = jnp.pad(x, ((0, 0), (0, Np - N), (0, Finp - Fin))).astype(jnp.bfloat16)
        wb = jnp.pad(weight, ((0, Finp - Fin), (0, Fp - Fout))).astype(jnp.bfloat16)
        W = Finp
    else:
        xb = jnp.pad(x, ((0, 0), (0, Np - N), (0, 0))).astype(jnp.bfloat16)
        wb = jnp.pad(weight, ((0, 0), (0, Fp - Fout))).astype(jnp.bfloat16)
        feat = _compute_support(xb, wb, Np, Fp)   # one x @ w pass, no recompute
        W = Fp

    b2 = None
    if bias is not None:
        b2 = jnp.reshape(bias, (1, -1)).astype(jnp.float32)
        b2 = jnp.pad(b2, ((0, 0), (0, Fp - Fout)))

    # Decoupled tiles: TK large for the streaming/contraction dim, TM bounded
    # by the out + accumulator VMEM footprint.
    TK = _pick_tile(Np, (512, 256, 128))
    TM = _pick_tile(Np, (256, 128))
    grid = (B, Np // TM, Np // TK)

    feat_spec = pl.BlockSpec((None, TK, W), lambda b, i, k: (b, k, 0))
    adj_spec = pl.BlockSpec((None, TM, TK), lambda b, i, k: (b, i, k))
    o_spec = pl.BlockSpec((None, TM, Fp), lambda b, i, k: (b, i, 0))

    in_specs = [feat_spec, adj_spec]
    args = [feat, adj_b]
    if fin_first:
        in_specs.append(pl.BlockSpec((Finp, Fp), lambda b, i, k: (0, 0)))
        args.append(wb)
    if bias is not None:
        in_specs.append(pl.BlockSpec((1, Fp), lambda b, i, k: (0, 0)))
        args.append(b2)

    kernel = _make_agg_kernel(fin_first, bias is not None)

    # VMEM estimate (double-buffered inputs/outputs + f32 accumulator); raise
    # the scoped limit only when the defaults (16/32 MiB) would be too small.
    out_isz = jnp.dtype(out_dtype).itemsize
    needed = (2 * TM * TK * 2                 # adj tile, bf16, double-buffered
              + 2 * TK * W * 2                # feat tile
              + 2 * TM * Fp * out_isz         # out tile
              + TM * W * 4                    # f32 accumulator
              + (2 * Finp * Fp * 2 if fin_first else 0)
              + (2 * Fp * 4 if bias is not None else 0))
    dims = ("parallel", "parallel", "arbitrary")
    if needed > 12 * 1024 * 1024:
        cparams = pltpu.CompilerParams(
            dimension_semantics=dims,
            vmem_limit_bytes=int(min(needed + (8 << 20), 56 << 20)))
    else:
        cparams = pltpu.CompilerParams(dimension_semantics=dims)

    out = pl.pallas_call(
        kernel,
        out_shape=jax.ShapeDtypeStruct((B, Np, Fp), out_dtype),
        grid_spec=pltpu.PrefetchScalarGridSpec(
            num_scalar_prefetch=0,
            grid=grid,
            in_specs=in_specs,
            out_specs=o_spec,
            scratch_shapes=[pltpu.VMEM((TM, W), jnp.float32)],
        ),
        compiler_params=cparams,
    )(*args)

    if Np != N or Fp != Fout:
        out = out[:, :N, :Fout]
    return out


def init_gcn_params(key, in_features, out_features, bias=False):
    """Deterministic init matching reset_parameters(): U(-stdv, stdv)."""
    stdv = 1.0 / math.sqrt(out_features)
    kw, kb = jax.random.split(key)
    weight = jax.random.uniform(
        kw, (in_features, out_features), jnp.float32, minval=-stdv, maxval=stdv)
    b = None
    if bias:
        b = jax.random.uniform(
            kb, (1, 1, out_features), jnp.float32, minval=-stdv, maxval=stdv)
    return weight, b


def _make_adj(key, B, N):
    a = jax.random.uniform(key, (B, N, N), jnp.float32)
    adj = (a + jnp.swapaxes(a, -1, -2)) * 0.5
    return adj / jnp.sum(adj, axis=-1, keepdims=True)


if __name__ == "__main__":
    key = jax.random.PRNGKey(0)
    k_x, k_adj, k_p, k_x2, k_adj2, k_p2 = jax.random.split(key, 6)

    # ---- Case 1: small graph (N=16 -> padded to 128), narrow Fin (padded to
    #      128, fin_first association), bias=True. ----
    B, N, Fin, Fout = 2, 16, 8, 32
    x = jax.random.normal(k_x, (B, N, Fin), jnp.float32)
    adj = _make_adj(k_adj, B, N)
    weight, bias = init_gcn_params(k_p, Fin, Fout, bias=True)

    out = jax.block_until_ready(graph_convolution(x, adj, weight, bias))
    ref = jnp.matmul(adj, jnp.matmul(x, weight)) + bias
    assert out.shape == (B, N, Fout)
    # Tolerance covers bf16 MXU inputs + the (benign) matmul reassociation.
    assert jnp.allclose(out, ref, atol=2e-2, rtol=2e-2), float(
        jnp.max(jnp.abs(out - ref)))

    # ---- Case 2: multi-tile reduction over nodes, Fin wider than padded Fout
    #      (support precomputed by the stage-A Pallas matmul), bias=False. ----
    B2, N2, Fin2, Fout2 = 2, 768, 192, 64
    x2 = jax.random.normal(k_x2, (B2, N2, Fin2), jnp.float32)
    adj2 = _make_adj(k_adj2, B2, N2)
    w2, _ = init_gcn_params(k_p2, Fin2, Fout2, bias=False)

    out2 = jax.block_until_ready(graph_convolution(x2, adj2, w2, None))
    ref2 = jnp.matmul(adj2, jnp.matmul(x2, w2))
    assert out2.shape == (B2, N2, Fout2)
    assert jnp.allclose(out2, ref2, atol=2e-2, rtol=2e-2), float(
        jnp.max(jnp.abs(out2 - ref2)))

    print("KERNEL_OK")
</pallas_src>

<mosaic_0001>
module attributes {stable_mosaic.version = 11 : i64} {
  func.func @kernel(%arg0: i32, %arg1: i32, %arg2: i32, %arg3: memref<1x128x128xbf16, #tpu.memory_space<vmem>>, %arg4: memref<1x128x128xbf16, #tpu.memory_space<vmem>>, %arg5: memref<128x128xbf16, #tpu.memory_space<vmem>>, %arg6: memref<1x128xf32, #tpu.memory_space<vmem>>, %arg7: memref<1x128x128xf32, #tpu.memory_space<vmem>>, %arg8: memref<128x128xf32, #tpu.memory_space<vmem>>) attributes {dimension_semantics = [#tpu.dimension_semantics<parallel>, #tpu.dimension_semantics<parallel>, #tpu.dimension_semantics<arbitrary>], iteration_bounds = array<i64: 2, 1, 1>, scalar_prefetch = 0 : i64, scratch_operands = 1 : i64, tpu.core_type = #tpu.core_type<tc>, window_params = [{transform_indices = @transform_0, window_bounds = array<i64: 1, 128, 128>}, {transform_indices = @transform_1, window_bounds = array<i64: 1, 128, 128>}, {pipeline_mode = #tpu.pipeline_mode<synchronous>, transform_indices = @transform_2, window_bounds = array<i64: 128, 128>}, {pipeline_mode = #tpu.pipeline_mode<synchronous>, transform_indices = @transform_3, window_bounds = array<i64: 1, 128>}, {transform_indices = @transform_4, window_bounds = array<i64: 1, 128, 128>}]} {
    %c0_i32 = arith.constant 0 : i32
    %0 = arith.cmpi eq, %arg2, %c0_i32 : i32
    %1 = arith.extui %0 : i1 to i32
    %c0_i32_0 = arith.constant 0 : i32
    %2 = arith.cmpi ne, %1, %c0_i32_0 : i32
    scf.if %2 {
      %cst_12 = arith.constant 0.000000e+00 : f32
      %14 = vector.broadcast %cst_12 : f32 to vector<128x128xf32>
      %c0_13 = arith.constant 0 : index
      %c0_14 = arith.constant 0 : index
      %15 = vector.load %arg8[%c0_13, %c0_14] : memref<128x128xf32, #tpu.memory_space<vmem>>, vector<128x128xf32>
      tpu.vector_store %arg8[%c0_13, %c0_14], %14 {strides = array<i32>} : memref<128x128xf32, #tpu.memory_space<vmem>>, vector<128x128xf32>,
    } else {
    }
    %c0 = arith.constant 0 : index
    %c0_1 = arith.constant 0 : index
    %3 = vector.load %arg8[%c0, %c0_1] : memref<128x128xf32, #tpu.memory_space<vmem>>, vector<128x128xf32>
    %c0_2 = arith.constant 0 : index
    %c0_3 = arith.constant 0 : index
    %c0_4 = arith.constant 0 : index
    %4 = vector.load %arg4[%c0_2, %c0_3, %c0_4] : memref<1x128x128xbf16, #tpu.memory_space<vmem>>, vector<1x128x128xbf16>
    %5 = vector.shape_cast %4 : vector<1x128x128xbf16> to vector<128x128xbf16>
    %c0_5 = arith.constant 0 : index
    %c0_6 = arith.constant 0 : index
    %c0_7 = arith.constant 0 : index
    %6 = vector.load %arg3[%c0_5, %c0_6, %c0_7] : memref<1x128x128xbf16, #tpu.memory_space<vmem>>, vector<1x128x128xbf16>
    %7 = vector.shape_cast %6 : vector<1x128x128xbf16> to vector<128x128xbf16>
    %cst = arith.constant dense<0.000000e+00> : vector<128x128xf32>
    %8 = tpu.matmul %5, %7, %cst {dimension_numbers = #tpu.dot_dimension_numbers<[1], [0], [0], [1], [0, 0, 1, 1], [], []>} : vector<128x128xbf16>, vector<128x128xbf16>, vector<128x128xf32> -> vector<128x128xf32>
    %9 = arith.addf %3, %8 : vector<128x128xf32>
    %c0_8 = arith.constant 0 : index
    %c0_9 = arith.constant 0 : index
    %10 = vector.load %arg8[%c0_8, %c0_9] : memref<128x128xf32, #tpu.memory_space<vmem>>, vector<128x128xf32>
    tpu.vector_store %arg8[%c0_8, %c0_9], %9 {strides = array<i32>} : memref<128x128xf32, #tpu.memory_space<vmem>>, vector<128x128xf32>,
    %c0_i32_10 = arith.constant 0 : i32
    %11 = arith.cmpi eq, %arg2, %c0_i32_10 : i32
    %12 = arith.extui %11 : i1 to i32
    %c0_i32_11 = arith.constant 0 : i32
    %13 = arith.cmpi ne, %12, %c0_i32_11 : i32
    scf.if %13 {
      %c0_12 = arith.constant 0 : index
      %c0_13 = arith.constant 0 : index
      %14 = vector.load %arg8[%c0_12, %c0_13] : memref<128x128xf32, #tpu.memory_space<vmem>>, vector<128x128xf32>
      %15 = arith.truncf %14 : vector<128x128xf32> to vector<128x128xbf16>
      %c0_14 = arith.constant 0 : index
      %c0_15 = arith.constant 0 : index
      %16 = vector.load %arg5[%c0_14, %c0_15] : memref<128x128xbf16, #tpu.memory_space<vmem>>, vector<128x128xbf16>
      %cst_16 = arith.constant dense<0.000000e+00> : vector<128x128xf32>
      %17 = tpu.matmul %15, %16, %cst_16 {dimension_numbers = #tpu.dot_dimension_numbers<[1], [0], [0], [1], [0, 0, 1, 1], [], []>} : vector<128x128xbf16>, vector<128x128xbf16>, vector<128x128xf32> -> vector<128x128xf32>
      %c0_17 = arith.constant 0 : index
      %c0_18 = arith.constant 0 : index
      %18 = vector.load %arg6[%c0_17, %c0_18] : memref<1x128xf32, #tpu.memory_space<vmem>>, vector<1x128xf32>
      %19 = vector.broadcast %18 : vector<1x128xf32> to vector<128x128xf32>
      %20 = arith.addf %17, %19 : vector<128x128xf32>
      %c0_19 = arith.constant 0 : index
      %c0_20 = arith.constant 0 : index
      %c0_21 = arith.constant 0 : index
      %21 = vector.load %arg7[%c0_19, %c0_20, %c0_21] : memref<1x128x128xf32, #tpu.memory_space<vmem>>, vector<1x128x128xf32>
      %22 = vector.shape_cast %21 : vector<1x128x128xf32> to vector<128x128xf32>
      %23 = vector.shape_cast %20 : vector<128x128xf32> to vector<1x128x128xf32>
      tpu.vector_store %arg7[%c0_19, %c0_20, %c0_21], %23 {strides = array<i32>} : memref<1x128x128xf32, #tpu.memory_space<vmem>>, vector<1x128x128xf32>,
    } else {
    }
    return
  }
  func.func @transform_0(%arg0: i32, %arg1: i32, %arg2: i32) -> (i32, i32, i32) {
    %c0_i32 = arith.constant 0 : i32
    %c0_i32_0 = arith.constant 0 : i32
    return %arg0, %arg2, %c0_i32 : i32, i32, i32
  }
  func.func @transform_1(%arg0: i32, %arg1: i32, %arg2: i32) -> (i32, i32, i32) {
    %c0_i32 = arith.constant 0 : i32
    return %arg0, %arg1, %arg2 : i32, i32, i32
  }
  func.func @transform_2(%arg0: i32, %arg1: i32, %arg2: i32) -> (i32, i32) {
    %c0_i32 = arith.constant 0 : i32
    %c0_i32_0 = arith.constant 0 : i32
    %c0_i32_1 = arith.constant 0 : i32
    return %c0_i32, %c0_i32_0 : i32, i32
  }
  func.func @transform_3(%arg0: i32, %arg1: i32, %arg2: i32) -> (i32, i32) {
    %c0_i32 = arith.constant 0 : i32
    %c0_i32_0 = arith.constant 0 : i32
    %c0_i32_1 = arith.constant 0 : i32
    return %c0_i32, %c0_i32_0 : i32, i32
  }
  func.func @transform_4(%arg0: i32, %arg1: i32, %arg2: i32) -> (i32, i32, i32) {
    %c0_i32 = arith.constant 0 : i32
    %c0_i32_0 = arith.constant 0 : i32
    return %arg0, %arg1, %c0_i32 : i32, i32, i32
  }
}

</mosaic_0001>

<bundles_post_ra>
// kernel: tpu_custom_call.1
= control target key start
LH: loop header
LB: loop body
LE: loop exit
PB: predicated region body
PF: predicated region fallthrough
CT: control target
= control target key end

     0   :  { %s1725_s0 = inlined_call_operand.hbm [shape: bf16[2,128,128], index: 0, kind: input, shape index: {}]   ;;  %s1726_s1 = inlined_call_operand.hbm [shape: bf16[2,128,128], index: 1, kind: input, shape index: {}]   ;;  %s1727_s2 = inlined_call_operand.hbm [shape: bf16[128,128], index: 2, kind: input, shape index: {}]   ;;  %s1728_s3 = inlined_call_operand.vmem [shape: f32[1,128], index: 3, kind: input, shape index: {}]   ;;  %s1729_s4 = inlined_call_operand.hbm [shape: f32[2,128,128], index: 4, kind: output, shape index: {}]  }
   0x1   :  { %1738 = sst [smem:[#allocation15_spill]] %s1725_s0 }
   0x2   :  { %1739 = sst [smem:[#allocation16_spill]] %s1727_s2 }
   0x3   :  { %9 = vsyncpa [#allocation4], 0 }
   0x4   :  { %11 = vsyncpa [#allocation4 + $0x1], 0 }
   0x5   :  { %12 = vsyncpa [#allocation7], 0 }
   0x6   :  { %14 = vsyncpa [#allocation7 + $0x1], 0 }
   0x7   :  { %15 = vsyncpa [#allocation5], 0 }
   0x8   :  { %17 = vsyncpa [#allocation5 + $0x1], 0  ;;  %s1416_s15 = smov 0   ;;  %s1418_s16 = smov 0  }
   0x9   :  { %s1420_s17 = smov 0   ;;  %s1422_s18 = smov 0  }
   0xa   :  { %s1424_s19 = smov 0   ;;  %s1426_s20 = smov 0  }
   0xb LB: > { %s1447_s21 = sadd.s32 4294967295, %s1381_s20   ;;  %s953_s22 = sadd.s32 4294967294, %s1381_s20   ;;  %s1381_s20 = sphi %s1426_s20, %s23_s20   ;;  %s1377_s19 = sphi %s1424_s19, %s1764_s19   ;;  %s1373_s18 = sphi %s1422_s18, %s1763_s18   ;;  %s1369_s17 = sphi %s1420_s17, %s1762_s17   ;;  %s1365_s16 = sphi %s1418_s16, %s1761_s16   ;;  %s1361_s15 = sphi %s1416_s15, %s1760_s15  }
   0xc   : > { %p64_p0 = scmp.ne.s32.totalorder %s1365_s16, %s1361_s15  ;;  %p1730_p1 = scmp.eq.s32.totalorder %s1447_s21, 0 }
   0xd   : > { %p168_p3 = scmp.eq.s32.totalorder %s953_s22, 1  ;;  %p954_p5 = scmp.ge.s32.totalorder %s1381_s20, 1 }
   0xe   : > { %p1456_p4 = por %p1730_p1, %p64_p0  ;;  %p175_p7 = scmp.lt.s32.totalorder %s1381_s20, 3 }
   0xf   : > { %p1461_p6 = por %p168_p3, %p64_p0  ;;  %s1383_s26 = smov [#allocation8]  }
  0x10   : > { %s1740_s23 = scalar_select %p1456_p4, 1, 0 }
  0x11   : > { %s1741_s24 = scalar_select %p1461_p6, 1, 0 }
  0x12   : > { %p1466_p8 = pnand %p954_p5, %p175_p7  ;;  %s187_s27 = sshll.u32 %s1383_s26, 4  ;;  %s188_s27 = int_to_ptr.vmem [resolvable:$true] %s187_s27 }
  0x13   : > { %s42_s29 = sadd.s32 1, %s1377_s19  ;;  %s1744_s2 = sld [smem:[#allocation16_spill]] }
  0x14   : > { %s1742_s25 = scalar_select %p1466_p8, 1, 0 }
  0x15   : > { %p1107_p9 = pneg %p1466_p8 }
  0x17   : > { %p1475_p11 = pnand %p1107_p9, %p1730_p1 }
  0x19   : > { %s1203_s6 = scalar_lea.hbm %s1744_s2, 1024  ;;  %p1205_p13 = pneg %p1475_p11 }
  0x1a   : > { %p1204_p12 = scmp.ne.s32.totalorder %s1744_s2, %s1203_s6  ;;  %p1210_p5 = scmp.lt.u32.totalorder %s1203_s6, %s1744_s2 }
  0x1c   : > { %p1206_p0 = pnand %p1205_p13, %p1204_p12 }
  0x1e   : > { %p1207_p3 = pneg %p1206_p0 }
  0x20   : > { %p1212_p7 = pnand %p1210_p5, %p1207_p3 }
  0x22   : > { %1215 = shalt.err (!%p1212_p7)
}
  0x23   : > { %s1216_s11 = scalar_lea.vmem %s188_s27, 1024  ;;  %p1224_p2 = scmp.lt.s32.totalorder %s188_s27, %s188_s27 }
  0x24   : > { %p1217_p9 = scmp.ne.s32.totalorder %s188_s27, %s1216_s11  ;;  %p1225_p6 = scmp.lt.s32.totalorder %s1216_s11, %s1216_s11 }
  0x26   : > { %p1219_p10 = pnand %p1217_p9, %p1205_p13  ;;  %p1226_p4 = por %p1225_p6, %p1224_p2 }
  0x28   : > { %p1220_p1 = pneg %p1219_p10 }
  0x2a   : > { %p1227_p8 = pnand %p1226_p4, %p1220_p1 }
  0x2c   : > { %1230 = shalt.err (!%p1227_p8)
}
  0x2d   : > { %s1733_s12 = smov 64   ;;  %s1735_s13 = smov 4  }
  0x2e   : > { %1110 = dma.hbm_to_vmem [thread:$0]  (!%p1475_p11), %s1744_s2, 1024, %s188_s27, [#allocation7], %s1733_s12, %s1733_s12, %s1735_s13  }
  0x2f   : > { %p44_p1 = scmp.ge.s32.totalorder %s42_s29, 2  ;;  %s51_s26 = sadd.s32 1, %s1369_s17 }
  0x30   : > { %p58_p2 = scmp.ne.s32.totalorder %s1369_s17, %s1365_s16  ;;  %p59_p4 = scmp.eq.s32.totalorder %s1381_s20, 0 }
  0x31   : > { %s1766_s29 = smov (%p44_p1, %s42_s29), 0  ;;  %p1747_p8 = scmp.eq.s32.totalorder %s1447_s21, 1 }
  0x32   : > { %1745 = sst [smem:[#allocation14_spill]] %s1766_s29  ;;  %p1505_p6 = por %p59_p4, %p58_p2 }
  0x33   : > { %p1511_p10 = por %p1747_p8, %p58_p2  ;;  %s46_s5 = ssub.s32 %s1377_s19, %s1766_s29 }
  0x34   : > { %p1123_p12 = scmp.lt.s32.totalorder %s1381_s20, 2  ;;  %p49_p11 = scmp.eq.s32.totalorder %s46_s5, 0 }
  0x35   : > { %s204_s27 = sand.u32 1, %s1369_s17   ;;  %s998_s8 = sshll.u32 %s1377_s19, 10 }
  0x36   : > { %s957_s6 = sshll.u32 %s204_s27, 6  ;;  %s1749_s0 = sld [smem:[#allocation15_spill]] }
  0x37   : > { %s1520_s7 = scalar_select %p49_p11, %s1369_s17, %s51_s26  }
  0x38   : > { %s208_s14 = scalar_lea.vmem [#allocation3], %s957_s6  ;;  %p1532_p13 = pnand %p1123_p12, %p1505_p6 }
  0x39   : > { %s217_s22 = sshll.u32 %s208_s14, 4  ;;  %s1539_s9 = scalar_lea.hbm %s1726_s1, %s998_s8  ;;  %s1528_s22 = int_to_ptr.vmem [resolvable:$true] %s217_s22 }
  0x3a   : > { %s231_s10 = scalar_lea.vmem [#allocation6], %s957_s6  ;;  %s1543_s2 = scalar_lea.sflag [#allocation4], %s204_s27 }
  0x3b   : > { %s1541_s13 = sshll.u32 %s231_s10, 4  ;;  %p1233_p3 = pneg %p1532_p13  ;;  %s1575_s13 = int_to_ptr.vmem [resolvable:$true] %s1541_s13 }
  0x3c   : > { %s1526_s11 = scalar_lea.hbm %s1749_s0, %s998_s8  ;;  %s1236_s12 = scalar_lea.hbm %s1749_s0, 2048 }
  0x3d   : > { %s1231_s14 = scalar_lea.hbm %s1526_s11, 1024  ;;  %p1237_p9 = scmp.lt.u32.totalorder %s1526_s11, %s1749_s0 }
  0x3e   : > { %p1232_p0 = scmp.ne.s32.totalorder %s1526_s11, %s1231_s14  ;;  %p1238_p1 = scmp.lt.u32.totalorder %s1236_s12, %s1231_s14 }
  0x3f   : > { %p1240_p4 = scmp.lt.u32.totalorder %s1231_s14, %s1526_s11 }
  0x40   : > { %p1234_p5 = pnand %p1233_p3, %p1232_p0  ;;  %p1239_p2 = por %p1238_p1, %p1237_p9 }
  0x42   : > { %p1235_p7 = pneg %p1234_p5  ;;  %p1241_p6 = por %p1240_p4, %p1239_p2 }
  0x44   : > { %p1242_p8 = pnand %p1241_p6, %p1235_p7 }
  0x46   : > { %1245 = shalt.err (!%p1242_p8)
}
  0x47   : > { %s1246_s27 = scalar_lea.vmem %s1528_s22, 1024  ;;  %s1386_s29 = smov [#allocation3]  }
  0x48   : > { %p1247_p12 = scmp.ne.s32.totalorder %s1528_s22, %s1246_s27  ;;  %s1251_s6 = sshll.u32 %s1386_s29, 4  ;;  %s1252_s6 = int_to_ptr.vmem [resolvable:$false] %s1251_s6 }
  0x49   : > { %s1253_s10 = scalar_lea.vmem %s1252_s6, 2048  ;;  %p1254_p5 = scmp.lt.s32.totalorder %s1528_s22, %s1252_s6 }
  0x4a   : > { %p1249_p11 = pnand %p1247_p12, %p1233_p3  ;;  %p1255_p9 = scmp.lt.s32.totalorder %s1253_s10, %s1246_s27 }
  0x4c   : > { %p1250_p0 = pneg %p1249_p11  ;;  %p1256_p1 = por %p1255_p9, %p1254_p5 }
  0x4e   : > { %p1257_p2 = pnand %p1256_p1, %p1250_p0 }
  0x50   : > { %1260 = shalt.err (!%p1257_p2)
}
  0x51   : > { %s1751_s14 = smov 4   ;;  %s1752_s30 = smov 64  }
  0x52   : > { %1114 = dma.hbm_to_vmem [thread:$0]  (!%p1532_p13), %s1526_s11, 1024, %s1528_s22, %s1543_s2, %s1752_s30, %s1752_s30, %s1751_s14  }
  0x53   : > { %s227_s12 = sand.u32 1, %s1381_s20   ;;  %s1261_s8 = scalar_lea.hbm %s1539_s9, 1024 }
  0x54   : > { %s1578_s26 = scalar_lea.sflag [#allocation7], %s227_s12  ;;  %p1262_p7 = scmp.ne.s32.totalorder %s1539_s9, %s1261_s8 }
  0x55   : > { %s1266_s6 = scalar_lea.hbm %s1726_s1, 2048  ;;  %p1267_p8 = scmp.lt.u32.totalorder %s1539_s9, %s1726_s1 }
  0x56   : > { %p1264_p4 = pnand %p1262_p7, %p1233_p3  ;;  %p1268_p12 = scmp.lt.u32.totalorder %s1266_s6, %s1261_s8 }
  0x57   : > { %p1270_p0 = scmp.lt.u32.totalorder %s1261_s8, %s1539_s9 }
  0x58   : > { %p1265_p6 = pneg %p1264_p4  ;;  %p1269_p11 = por %p1268_p12, %p1267_p8 }
  0x5a   : > { %p1271_p5 = por %p1270_p0, %p1269_p11 }
  0x5c   : > { %p1272_p9 = pnand %p1271_p5, %p1265_p6 }
  0x5e   : > { %1275 = shalt.err (!%p1272_p9)
}
  0x5f   : > { %s1276_s2 = scalar_lea.vmem %s1575_s13, 1024  ;;  %s1387_s11 = smov [#allocation6]  }
  0x60   : > { %p1277_p1 = scmp.ne.s32.totalorder %s1575_s13, %s1276_s2  ;;  %s1281_s22 = sshll.u32 %s1387_s11, 4  ;;  %s1282_s22 = int_to_ptr.vmem [resolvable:$false] %s1281_s22 }
  0x61   : > { %s1283_s0 = scalar_lea.vmem %s1282_s22, 2048  ;;  %p1284_p4 = scmp.lt.s32.totalorder %s1575_s13, %s1282_s22 }
  0x62   : > { %p1279_p2 = pnand %p1277_p1, %p1233_p3  ;;  %p1285_p8 = scmp.lt.s32.totalorder %s1283_s0, %s1276_s2 }
  0x64   : > { %p1280_p7 = pneg %p1279_p2  ;;  %p1286_p12 = por %p1285_p8, %p1284_p4 }
  0x66   : > { %p1287_p11 = pnand %p1286_p12, %p1280_p7 }
  0x68   : > { %1290 = shalt.err (!%p1287_p11)
}
  0x69   : > { %1117 = dma.hbm_to_vmem [thread:$0]  (!%p1532_p13), %s1539_s9, 1024, %s1575_s13, %s1578_s26, %s1752_s30, %s1752_s30, %s1751_s14  }
  0x6a   : > { %p1753_p3 = scmp.ne.s32.totalorder %s1742_s25, 0 }
  0x6b   : > { %s1610_s12 = sand.u32 (!%p1753_p3), 1, %s1365_s16   ;;  %p1754_p6 = scmp.ne.s32.totalorder (!%p1753_p3), %s1740_s23, 0 }
  0x6c   : > { %253 = sbr.rel (%p1753_p3) target bundleno = 629 (0x275), region = 36  ;;  %s964_s8 = sshll.u32 (!%p1753_p3), %s1610_s12, 6 }
  0x6d   : > { %s256_s27 = scalar_lea.sflag (!%p1753_p3), [#allocation4], %s1610_s12  ;;  %s1614_s29 = scalar_lea.vmem (!%p1753_p3), [#allocation3], %s964_s8 }
  0x73   : > { %1344 = dma.done.wait (%p1754_p6), %s256_s27, 1024  }
  0x74   : > { %1346 = vsyncadd (%p1754_p6), %s256_s27, 4294966272  ;;  %s264_s13 = sand.u32 1, %s1447_s21   ;;  %s1621_s5 = scalar_lea.vmem [#allocation6], %s964_s8 }
  0x75   : > { %s265_s25 = scalar_lea.sflag [#allocation7], %s264_s13 }
  0x76   : > { %1348 = dma.done.wait (%p1754_p6), %s265_s25, 1024  }
  0x77   : > { %1350 = vsyncadd (%p1754_p6), %s265_s25, 4294966272  ;;  %p1755_p13 = scmp.eq.s32.totalorder %s1447_s21, 0 }
  0x79   : > { %1352 = dma.done.wait (%p1755_p13), [#allocation7], 1024   ;;  %p1756_p0 = pmov %p1755_p13 }
  0x7a   : > { %v1179_v0 = vld [vmem:[%s1614_s29] sm:$0xff]   ;;  %v1180_v1 = vld [vmem:[%s1614_s29 + $0x8] sm:$0xff]   ;;  %v1181_v2 = vld [vmem:[%s1614_s29 + $0x10] sm:$0xff]   ;;  %s967_s21 = sshll.u32 %s1610_s12, 7  ;;  %s1000_s30 = sshll.u32 %s1373_s18, 11 }
  0x7b   : > { %1354 = vsyncadd (%p1756_p0), [#allocation7], 4294966272  ;;  %1033 = vmatprep.subr.bf16.mxu0 %v1179_v0  ;;  %v1182_v3 = vld [vmem:[%s1614_s29 + $0x18] sm:$0xff]   ;;  %v1187_v4 = vld [vmem:[%s1621_s5] sm:$0xff]   ;;  %s1651_s14 = scalar_lea.vmem [#allocation9], %s967_s21  ;;  %s1671_s2 = scalar_lea.hbm %s1729_s4, %s1000_s30 }
  0x7c   : > { %1034 = vmatpush3.bf16.msra.mxu0 %v1179_v0  ;;  %1049 = vmatprep.mubr.bf16.mxu0 %v1187_v4  ;;  %v1183_v5 = vld [vmem:[%s1614_s29 + $0x20] sm:$0xff]   ;;  %v1184_v6 = vld [vmem:[%s1614_s29 + $0x28] sm:$0xff]   ;;  %v1185_v9 = vld [vmem:[%s1614_s29 + $0x30] sm:$0xff]   ;;  %s826_s26 = sshll.u32 %s1651_s14, 4  ;;  %s811_s18 = scalar_lea.sflag [#allocation5], %s1610_s12  ;;  %s1673_s26 = int_to_ptr.vmem [resolvable:$true] %s826_s26 }
  0x7d   : > { %1035 = vmatprep.subr.bf16.mxu0 %v1180_v1  ;;  %v1195_v7 = vld [vmem:[#allocation8] sm:$0xff]   ;;  %v1196_v8 = vld [vmem:[#allocation8 + $0x8] sm:$0xff]   ;;  %v1197_v10 = vld [vmem:[#allocation8 + $0x10] sm:$0xff]   ;;  %s1291_s11 = scalar_lea.vmem %s1673_s26, 2048  ;;  %s1388_s22 = smov [#allocation9]  }
  0x7e   : > { %1065 = vmatprep.subr.bf16.mxu1 %v1195_v7  ;;  %v1186_v11 = vld [vmem:[%s1614_s29 + $0x38] sm:$0xff]   ;;  %v1199_v13 = vld [vmem:[#allocation8 + $0x20] sm:$0xff]   ;;  %v1188_v14 = vld [vmem:[%s1621_s5 + $0x8] sm:$0xff]   ;;  %p1292_p5 = scmp.ne.s32.totalorder %s1673_s26, %s1291_s11  ;;  %s1295_s0 = sshll.u32 %s1388_s22, 4  ;;  %s1296_s0 = int_to_ptr.vmem [resolvable:$false] %s1295_s0 }
  0x7f   : > { %1066 = vmatpush3.bf16.msra.mxu1 %v1195_v7  ;;  %v1198_v12 = vld [vmem:[#allocation8 + $0x18] sm:$0xff]   ;;  %v1189_v15 = vld [vmem:[%s1621_s5 + $0x10] sm:$0xff]   ;;  %v1200_v16 = vld [vmem:[#allocation8 + $0x28] sm:$0xff]   ;;  %s1297_s8 = scalar_lea.vmem %s1296_s0, 4096  ;;  %p1298_p2 = scmp.lt.s32.totalorder %s1673_s26, %s1296_s0 }
  0x80   : > { %1036 = vmatpush3.bf16.msra.mxu0 %v1180_v1  ;;  %1067 = vmatprep.subr.bf16.mxu1 %v1196_v8  ;;  %v1201_v17 = vld [vmem:[#allocation8 + $0x30] sm:$0xff]   ;;  %v1190_v18 = vld [vmem:[%s1621_s5 + $0x18] sm:$0xff]   ;;  %v1191_v19 = vld [vmem:[%s1621_s5 + $0x20] sm:$0xff]   ;;  %p1293_p9 = pnand %p1292_p5, %p1511_p10  ;;  %p1299_p7 = scmp.lt.s32.totalorder %s1297_s8, %s1291_s11 }
  0x81   : > { %1037 = vmatprep.subr.bf16.mxu0 %v1181_v2  ;;  %v1192_v20 = vld [vmem:[%s1621_s5 + $0x28] sm:$0xff]   ;;  %v1193_v21 = vld [vmem:[%s1621_s5 + $0x30] sm:$0xff]   ;;  %v1194_v22 = vld [vmem:[%s1621_s5 + $0x38] sm:$0xff]  }
  0x82   : > { %v1202_v23 = vld [vmem:[#allocation8 + $0x38] sm:$0xff]   ;;  %v984_v48 = vld [vmem:[%s1728_s3] ss:$0 sm:$0xff]  ;;  %p1294_p1 = pneg %p1293_p9  ;;  %p1300_p4 = por %p1299_p7, %p1298_p2 }
  0x83   : > { %1068 = vmatpush3.bf16.msra.mxu1 %v1196_v8 }
  0x84   : > { %1038 = vmatpush3.bf16.msra.mxu0 %v1181_v2  ;;  %1069 = vmatprep.subr.bf16.mxu1 %v1197_v10  ;;  %p1301_p8 = pnand %p1300_p4, %p1294_p1 }
  0x85   : > { %1039 = vmatprep.subr.bf16.mxu0 %v1182_v3 }
  0x87   : > { %1070 = vmatpush3.bf16.msra.mxu1 %v1197_v10 }
  0x88   : > { %1040 = vmatpush3.bf16.msra.mxu0 %v1182_v3  ;;  %1071 = vmatprep.subr.bf16.mxu1 %v1198_v12 }
  0x89   : > { %1041 = vmatprep.subr.bf16.mxu0 %v1183_v5 }
  0x8b   : > { %1072 = vmatpush3.bf16.msra.mxu1 %v1198_v12 }
  0x8c   : > { %1042 = vmatpush3.bf16.msra.mxu0 %v1183_v5  ;;  %1073 = vmatprep.subr.bf16.mxu1 %v1199_v13 }
  0x8d   : > { %1043 = vmatprep.subr.bf16.mxu0 %v1184_v6 }
  0x8f   : > { %1074 = vmatpush3.bf16.msra.mxu1 %v1199_v13 }
  0x90   : > { %1044 = vmatpush3.bf16.msra.mxu0 %v1184_v6  ;;  %1075 = vmatprep.subr.bf16.mxu1 %v1200_v16 }
  0x91   : > { %1045 = vmatprep.subr.bf16.mxu0 %v1185_v9 }
  0x93   : > { %1076 = vmatpush3.bf16.msra.mxu1 %v1200_v16 }
  0x94   : > { %1046 = vmatpush3.bf16.msra.mxu0 %v1185_v9  ;;  %1077 = vmatprep.subr.bf16.mxu1 %v1201_v17 }
  0x95   : > { %1047 = vmatprep.subr.bf16.mxu0 %v1186_v11 }
  0x97   : > { %1078 = vmatpush3.bf16.msra.mxu1 %v1201_v17 }
  0x98   : > { %1048 = vmatpush3.bf16.msra.mxu0 %v1186_v11  ;;  %1079 = vmatprep.subr.bf16.mxu1 %v1202_v23 }
  0x9b   : > { %1050 = vmatmul.mubr.bf16.vlgmr.msra.gmra.mrb[0].mxu0 %v1188_v14  ;;  %1080 = vmatpush3.bf16.msra.mxu1 %v1202_v23 }
  0x9c   : > { %1053 = vmatprep.mubr.bf16.mxu0 %v1189_v15 }
  0xa3   : > { %1054 = vmatmul.mubr.bf16.gmra.mrb[4].mxu0 %v1190_v18 }
  0xa4   : > { %1057 = vmatprep.mubr.bf16.mxu0 %v1191_v19 }
  0xab   : > { %1058 = vmatmul.mubr.bf16.gmra.mrb[8].mxu0 %v1192_v20 }
  0xac   : > { %1061 = vmatprep.mubr.bf16.mxu0 %v1193_v21 }
  0xb3   : > { %1062 = vmatmul.mubr.bf16.gmra.mrb[12].mxu0 %v1194_v22 }
 0x16e   : > { %v1051_v24 = vpop.f32.mrb[0].mxu0 }
 0x16f   : > { %v504_v25 = vpop.f32.mrb[1].mxu0 }
 0x170   : > { %v1052_v26 = vpop.f32.mrb[2].mxu0 }
 0x171   : > { %v619_v27 = vpack.c.bf16 %v1052_v26, %v1051_v24  ;;  %v507_v28 = vpop.f32.mrb[3].mxu0 }
 0x172   : > { %v618_v29 = vpack.c.bf16 %v507_v28, %v504_v25 }
 0x174   : > { %1081 = vmatprep.mubr.bf16.mxu1 %v618_v29 }
 0x175   : > { %1082 = vmatmul.mubr.bf16.vlgmr.msra.gmra.mrb[0].mxu1 %v619_v27 }
 0x176   : > { %v1055_v30 = vpop.f32.mrb[4].mxu0 }
 0x177   : > { %v520_v31 = vpop.f32.mrb[5].mxu0 }
 0x178   : > { %v1056_v32 = vpop.f32.mrb[6].mxu0 }
 0x179   : > { %v621_v33 = vpack.c.bf16 %v1056_v32, %v1055_v30  ;;  %v523_v34 = vpop.f32.mrb[7].mxu0 }
 0x17a   : > { %v620_v35 = vpack.c.bf16 %v523_v34, %v520_v31 }
 0x17c   : > { %1085 = vmatprep.mubr.bf16.mxu1 %v620_v35 }
 0x17d   : > { %1086 = vmatmul.mubr.bf16.gmra.mrb[4].mxu1 %v621_v33 }
 0x17e   : > { %v1059_v36 = vpop.f32.mrb[8].mxu0 }
 0x17f   : > { %v536_v37 = vpop.f32.mrb[9].mxu0 }
 0x180   : > { %v1060_v38 = vpop.f32.mrb[10].mxu0 }
 0x181   : > { %v623_v39 = vpack.c.bf16 %v1060_v38, %v1059_v36  ;;  %v539_v40 = vpop.f32.mrb[11].mxu0 }
 0x182   : > { %v622_v41 = vpack.c.bf16 %v539_v40, %v536_v37 }
 0x184   : > { %1089 = vmatprep.mubr.bf16.mxu1 %v622_v41 }
 0x185   : > { %1090 = vmatmul.mubr.bf16.gmra.mrb[8].mxu1 %v623_v39 }
 0x186   : > { %v1063_v42 = vpop.f32.mrb[12].mxu0 }
 0x187   : > { %v552_v43 = vpop.f32.mrb[13].mxu0 }
 0x188   : > { %v1064_v44 = vpop.f32.mrb[14].mxu0 }
 0x189   : > { %v625_v45 = vpack.c.bf16 %v1064_v44, %v1063_v42  ;;  %v555_v46 = vpop.f32.mrb[15].mxu0 }
 0x18a   : > { %v624_v47 = vpack.c.bf16 %v555_v46, %v552_v43 }
 0x18c   : > { %1093 = vmatprep.mubr.bf16.mxu1 %v624_v47 }
 0x18d   : > { %1094 = vmatmul.mubr.bf16.gmra.mrb[12].mxu1 %v625_v45 }
 0x248   : > { %v1083_v49 = vpop.f32.mrb[0].mxu1 }
 0x249   : > { %v740_v50 = vadd.f32 %v1083_v49, %v984_v48  ;;  %v731_v51 = vpop.f32.mrb[1].mxu1 }
 0x24a   : > { %v732_v52 = vadd.f32 %v984_v48, %v731_v51  ;;  %v1084_v53 = vpop.f32.mrb[2].mxu1 }
 0x24b   : > { %796 = vst [vmem:[%s1651_s14 + $0x10] sm:$0xff] %v740_v50  ;;  %v743_v54 = vadd.f32 %v1084_v53, %v984_v48  ;;  %v734_v55 = vpop.f32.mrb[3].mxu1 }
 0x24c   : > { %794 = vst [vmem:[%s1651_s14] sm:$0xff] %v732_v52  ;;  %v735_v56 = vadd.f32 %v984_v48, %v734_v55 }
 0x24d   : > { %797 = vst [vmem:[%s1651_s14 + $0x18] sm:$0xff] %v743_v54 }
 0x24e   : > { %795 = vst [vmem:[%s1651_s14 + $0x8] sm:$0xff] %v735_v56 }
 0x250   : > { %v1087_v57 = vpop.f32.mrb[4].mxu1 }
 0x251   : > { %v756_v58 = vadd.f32 %v1087_v57, %v984_v48  ;;  %v747_v59 = vpop.f32.mrb[5].mxu1 }
 0x252   : > { %v748_v60 = vadd.f32 %v984_v48, %v747_v59  ;;  %v1088_v61 = vpop.f32.mrb[6].mxu1 }
 0x253   : > { %800 = vst [vmem:[%s1651_s14 + $0x30] sm:$0xff] %v756_v58  ;;  %v759_v62 = vadd.f32 %v1088_v61, %v984_v48  ;;  %v750_v63 = vpop.f32.mrb[7].mxu1 }
 0x254   : > { %798 = vst [vmem:[%s1651_s14 + $0x20] sm:$0xff] %v748_v60  ;;  %v751_v0 = vadd.f32 %v984_v48, %v750_v63 }
 0x255   : > { %801 = vst [vmem:[%s1651_s14 + $0x38] sm:$0xff] %v759_v62 }
 0x256   : > { %799 = vst [vmem:[%s1651_s14 + $0x28] sm:$0xff] %v751_v0 }
 0x258   : > { %v1091_v1 = vpop.f32.mrb[8].mxu1 }
 0x259   : > { %v772_v2 = vadd.f32 %v1091_v1, %v984_v48  ;;  %v763_v3 = vpop.f32.mrb[9].mxu1 }
 0x25a   : > { %v764_v4 = vadd.f32 %v984_v48, %v763_v3  ;;  %v1092_v5 = vpop.f32.mrb[10].mxu1 }
 0x25b   : > { %804 = vst [vmem:[%s1651_s14 + $0x50] sm:$0xff] %v772_v2  ;;  %v775_v6 = vadd.f32 %v1092_v5, %v984_v48  ;;  %v766_v7 = vpop.f32.mrb[11].mxu1 }
 0x25c   : > { %802 = vst [vmem:[%s1651_s14 + $0x40] sm:$0xff] %v764_v4  ;;  %v767_v8 = vadd.f32 %v984_v48, %v766_v7 }
 0x25d   : > { %805 = vst [vmem:[%s1651_s14 + $0x58] sm:$0xff] %v775_v6 }
 0x25e   : > { %803 = vst [vmem:[%s1651_s14 + $0x48] sm:$0xff] %v767_v8 }
 0x260   : > { %v1095_v9 = vpop.f32.mrb[12].mxu1 }
 0x261   : > { %v788_v10 = vadd.f32 %v1095_v9, %v984_v48  ;;  %v779_v11 = vpop.f32.mrb[13].mxu1 }
 0x262   : > { %v780_v12 = vadd.f32 %v984_v48, %v779_v11  ;;  %v1096_v13 = vpop.f32.mrb[14].mxu1 }
 0x263   : > { %808 = vst [vmem:[%s1651_s14 + $0x70] sm:$0xff] %v788_v10  ;;  %v791_v14 = vadd.f32 %v1096_v13, %v984_v48  ;;  %v782_v15 = vpop.f32.mrb[15].mxu1 }
 0x264   : > { %806 = vst [vmem:[%s1651_s14 + $0x60] sm:$0xff] %v780_v12  ;;  %v783_v16 = vadd.f32 %v984_v48, %v782_v15 }
 0x265   : > { %809 = vst [vmem:[%s1651_s14 + $0x78] sm:$0xff] %v791_v14 }
 0x266   : > { %807 = vst [vmem:[%s1651_s14 + $0x68] sm:$0xff] %v783_v16 }
 0x267   : > { %1304 = shalt.err (!%p1301_p8)
}
 0x268   : > { %s1305_s27 = scalar_lea.hbm %s1671_s2, 2048  ;;  %s1309_s25 = scalar_lea.hbm %s1729_s4, 4096 }
 0x269   : > { %p1306_p12 = scmp.ne.s32.totalorder %s1671_s2, %s1305_s27  ;;  %p1310_p6 = scmp.lt.u32.totalorder %s1671_s2, %s1729_s4 }
 0x26a   : > { %p1311_p13 = scmp.lt.u32.totalorder %s1309_s25, %s1305_s27  ;;  %p1313_p5 = scmp.lt.u32.totalorder %s1305_s27, %s1671_s2 }
 0x26b   : > { %p1307_p11 = pnand %p1306_p12, %p1511_p10 }
 0x26c   : > { %p1312_p0 = por %p1311_p13, %p1310_p6 }
 0x26d   : > { %p1308_p3 = pneg %p1307_p11 }
 0x26e   : > { %p1314_p9 = por %p1313_p5, %p1312_p0 }
 0x270   : > { %p1315_p1 = pnand %p1314_p9, %p1308_p3 }
 0x272   : > { %1318 = shalt.err (!%p1315_p1)
}
 0x273   : > { %s1389_s23 = smov 128   ;;  %s1390_s9 = smov 8  }
 0x274   : > { %1105 = dma.vmem_to_hbm [thread:$0]  (%p1511_p10), %s1673_s26, 2048, %s1671_s2, %s811_s18, %s1389_s23, %s1389_s23, %s1390_s9  }
 0x275 PF: > { %s841_s14 = sand.u32 1, %s1361_s15   ;;  %p1757_p2 = scmp.ne.s32.totalorder %s1741_s24, 0 }
 0x276   : > { %p1758_p7 = scmp.ge.s32.totalorder %s1381_s20, 2  ;;  %s842_s30 = scalar_lea.sflag [#allocation5], %s841_s14 }
 0x278   : > { %p1119_p4 = pnand %p1758_p7, %p1757_p2 }
 0x27a   : > { %1356 = dma.done.wait (!%p1119_p4), %s842_s30, 2048  }
 0x27b   : > { %1358 = vsyncadd (!%p1119_p4), %s842_s30, 4294965248  ;;  %s23_s20 = sadd.s32 1, %s1381_s20   ;;  %s1759_s28 = sld [smem:[#allocation14_spill]] }
 0x27c   : > { %p20_p8 = scmp.ge.s32.totalorder %s23_s20, 4   ;;  %s1760_s15 = smov %s1365_s16 }
 0x27d   : > { %s1761_s16 = smov %s1369_s17  ;;  %s1762_s17 = smov %s1520_s7 }
 0x27e   : > { %s1763_s18 = smov %s1377_s19  ;;  %22 = sbr.rel (!%p20_p8) target bundleno = 11 (0xb), region = 106 }
 0x281   : > { %s1764_s19 = smov %s1759_s28 }
 0x285   :  { %847 = vsyncpa [#allocation4], 1 }
 0x286   :  { %849 = vsyncpa [#allocation4 + $0x1], 1 }
 0x287   :  { %850 = vsyncpa [#allocation7], 1 }
 0x288   :  { %852 = vsyncpa [#allocation7 + $0x1], 1 }
 0x289   :  { %853 = vsyncpa [#allocation5], 1 }
 0x28a   :  { %855 = vsyncpa [#allocation5 + $0x1], 1 }

</bundles_post_ra>
